<compile_context>
chip_gen: v5e
topology: v5e:2x2
jax: 0.10.0
libtpu: 0.0.40
codegen_flags: <defaults>
</compile_context>

<pallas_src>
import jax
import jax.numpy as jnp
from jax.experimental import pallas as pl
from jax.experimental.pallas import tpu as pltpu

_LANES = 128            # minor dim: one full 128-lane vreg -> unmasked vst
_MAX_BLOCK_ROWS = 8192  # 8192 x 128 f32 = 4 MiB per block (2x in + 2x out = 16 MiB)
_MIN_GRID = 8           # target >= 8 grid steps: pipelining overlap + v7x 2-TC sharding


def _cdiv(a, b):
    return (a + b - 1) // b


def _round_up(v, m):
    return _cdiv(v, m) * m


def _h_swish_kernel(x_ref, o_ref):
    # h_swish(x) = x * relu6(x + 3) / 6, computed directly in the input dtype.
    x = x_ref[...]
    o_ref[...] = x * (jnp.clip(x + 3.0, 0.0, 6.0) * (1.0 / 6.0))


@jax.jit
def h_swish(x):
    """Elementwise h_swish via a lane-dense, tiled Pallas TPU kernel."""
    orig_shape = x.shape
    n = x.size
    if n == 0:
        return x

    rows = _cdiv(n, _LANES)
    padded = rows * _LANES

    # Block-row choice: aim for >= _MIN_GRID grid steps (DMA/compute overlap,
    # megacore sharding) while capping each block at ~4 MiB of f32; never let
    # the block exceed the array (a full-extent block dim is always legal).
    bm = min(_MAX_BLOCK_ROWS, _round_up(_cdiv(rows, _MIN_GRID), 8))
    if bm >= rows:
        bm = rows
    grid = _cdiv(rows, bm)

    flat = x.reshape(-1)
    needs_pad = padded != n
    if needs_pad:
        # Slow path only when total size is not a multiple of 128 lanes
        # (pads < 128 elements, but costs the extra pad/slice HBM copies).
        flat = jnp.pad(flat, (0, padded - n))
    x2d = flat.reshape(rows, _LANES)

    # Explicit VMEM budget: double-buffered input + output blocks + headroom,
    # capped well under the smallest per-TC VMEM (64 MiB on v7x).
    block_bytes = bm * _LANES * x2d.dtype.itemsize
    vmem_limit = min(4 * block_bytes + (2 << 20), 48 << 20)

    out = pl.pallas_call(
        _h_swish_kernel,
        out_shape=jax.ShapeDtypeStruct((rows, _LANES), x.dtype),
        grid=(grid,),
        in_specs=[pl.BlockSpec((bm, _LANES), lambda i: (i, 0))],
        out_specs=pl.BlockSpec((bm, _LANES), lambda i: (i, 0)),
        compiler_params=pltpu.CompilerParams(
            dimension_semantics=("parallel",),
            vmem_limit_bytes=vmem_limit),
    )(x2d)

    if needs_pad:
        return out.reshape(-1)[:n].reshape(orig_shape)
    return out.reshape(orig_shape)


if __name__ == "__main__":
    # Small NCHW input, matching how the module is used inside the UNet.
    # 2*4*16*16 = 2048 elements -> multiple of 128, so the pad-free fast path
    # is exercised (rows=16, bm=8, grid=2).
    x = jax.random.normal(jax.random.PRNGKey(0), (2, 4, 16, 16), jnp.float32)

    y = jax.block_until_ready(h_swish(x))

    # Reference: x * relu6(x + 3) / 6
    ref = x * jnp.clip(x + 3.0, 0.0, 6.0) / 6.0
    assert y.shape == x.shape and y.dtype == x.dtype
    assert bool(jnp.all(jnp.isfinite(y)))
    assert bool(jnp.allclose(y, ref, atol=1e-5, rtol=1e-5))

    # Also sanity-check a non-128-multiple size (slow path) and bf16.
    x2 = jax.random.normal(jax.random.PRNGKey(1), (3, 5, 7), jnp.float32)
    y2 = jax.block_until_ready(h_swish(x2))
    ref2 = x2 * jnp.clip(x2 + 3.0, 0.0, 6.0) / 6.0
    assert bool(jnp.allclose(y2, ref2, atol=1e-5, rtol=1e-5))

    x3 = jax.random.normal(jax.random.PRNGKey(2), (2, 8, 32, 32), jnp.bfloat16)
    y3 = jax.block_until_ready(h_swish(x3))
    ref3 = (x3 * jnp.clip(x3 + 3.0, 0.0, 6.0) / 6.0).astype(jnp.bfloat16)
    assert y3.dtype == jnp.bfloat16
    assert bool(jnp.allclose(y3.astype(jnp.float32), ref3.astype(jnp.float32),
                             atol=2e-2, rtol=2e-2))

    print("KERNEL_OK")
</pallas_src>

<mosaic_0001>
module attributes {stable_mosaic.version = 11 : i64} {
  func.func @_h_swish_kernel(%arg0: i32, %arg1: memref<8x128xf32, #tpu.memory_space<vmem>>, %arg2: memref<8x128xf32, #tpu.memory_space<vmem>>) attributes {dimension_semantics = [#tpu.dimension_semantics<parallel>], iteration_bounds = array<i64: 2>, scalar_prefetch = 0 : i64, scratch_operands = 0 : i64, tpu.core_type = #tpu.core_type<tc>, window_params = [{transform_indices = @transform_0, window_bounds = array<i64: 8, 128>}, {transform_indices = @transform_1, window_bounds = array<i64: 8, 128>}]} {
    %c0 = arith.constant 0 : index
    %c0_0 = arith.constant 0 : index
    %0 = vector.load %arg1[%c0, %c0_0] : memref<8x128xf32, #tpu.memory_space<vmem>>, vector<8x128xf32>
    %cst = arith.constant 3.000000e+00 : f32
    %1 = vector.broadcast %cst : f32 to vector<8x128xf32>
    %2 = arith.addf %0, %1 : vector<8x128xf32>
    %cst_1 = arith.constant 0.000000e+00 : f32
    %cst_2 = arith.constant 6.000000e+00 : f32
    %3 = vector.broadcast %cst_1 : f32 to vector<8x128xf32>
    %4 = arith.maximumf %3, %2 : vector<8x128xf32>
    %5 = vector.broadcast %cst_2 : f32 to vector<8x128xf32>
    %6 = arith.minimumf %5, %4 : vector<8x128xf32>
    %cst_3 = arith.constant 0.166666672 : f32
    %7 = vector.broadcast %cst_3 : f32 to vector<8x128xf32>
    %8 = arith.mulf %6, %7 : vector<8x128xf32>
    %9 = arith.mulf %0, %8 : vector<8x128xf32>
    %c0_4 = arith.constant 0 : index
    %c0_5 = arith.constant 0 : index
    %10 = vector.load %arg2[%c0_4, %c0_5] : memref<8x128xf32, #tpu.memory_space<vmem>>, vector<8x128xf32>
    tpu.vector_store %arg2[%c0_4, %c0_5], %9 {strides = array<i32>} : memref<8x128xf32, #tpu.memory_space<vmem>>, vector<8x128xf32>,
    return
  }
  func.func @transform_0(%arg0: i32) -> (i32, i32) {
    %c0_i32 = arith.constant 0 : i32
    %c0_i32_0 = arith.constant 0 : i32
    return %arg0, %c0_i32 : i32, i32
  }
  func.func @transform_1(%arg0: i32) -> (i32, i32) {
    %c0_i32 = arith.constant 0 : i32
    %c0_i32_0 = arith.constant 0 : i32
    return %arg0, %c0_i32 : i32, i32
  }
}

</mosaic_0001>

<bundles_post_ra>
// kernel: h_swish.1
= control target key start
LH: loop header
LB: loop body
LE: loop exit
PB: predicated region body
PF: predicated region fallthrough
CT: control target
= control target key end

     0   :  { %s193_s6 = smov 0   ;;  %s213_s0 = inlined_call_operand.vmem [shape: f32[16,128], index: 0, kind: input, shape index: {}]   ;;  %s214_s1 = inlined_call_operand.vmem [shape: f32[16,128], index: 1, kind: output, shape index: {}]  }
   0x1 LB: > { %s172_s7 = sadd.s32 4294967295, %s195_s6   ;;  %p176_p0 = scmp.ge.s32.totalorder %s195_s6, 1  ;;  %s195_s6 = sphi %s193_s6, %s11_s6  }
   0x2   : > { %p86_p1 = scmp.lt.s32.totalorder %s195_s6, 3 }
   0x4   : > { %p87_p2 = pnand %p176_p0, %p86_p1 }
   0x5   : > { %p104_p3 = scmp.lt.s32.totalorder (!%p87_p2), %s172_s7, 1 }
   0x6   : > { %90 = sbr.rel (%p87_p2) target bundleno = 26 (0x1a), region = 24 }
   0xb   : > { %s216_s7 = smov (!%p104_p3, %s172_s7), 1 }
   0xc   : > { %s177_s8 = sshll.u32 %s216_s7, 3 }
   0xd   : > { %s107_s11 = scalar_lea.vmem %s213_s0, %s177_s8  ;;  %s111_s14 = scalar_lea.vmem %s214_s1, %s177_s8 }
   0xe   : > { %v112_v0 = vld [vmem:[%s107_s11] sm:$0xff] }
   0xf   : > { %v113_v1 = vadd.f32 3.0, %v112_v0 }
  0x11   : > { %v114_v2 = vmax.f32 %v113_v1, 0.0 }
  0x13   : > { %v115_v3 = vmin.f32 %v114_v2, 6.0 }
  0x15   : > { %v116_v4 = vmul.f32 0.16666667, %v115_v3 }
  0x17   : > { %v117_v5 = vmul.f32 %v116_v4, %v112_v0 }
  0x19   : > { %118 = vst [vmem:[%s111_s14] sm:$0xff] %v117_v5 }
  0x1a PF: > { %s11_s6 = sadd.s32 1, %s195_s6  }
  0x1b   : > { %p8_p4 = scmp.ge.s32.totalorder %s11_s6, 4  }
  0x1d   :  { %10 = sbr.rel (!%p8_p4) target bundleno = 1 (0x1), region = 54 }

</bundles_post_ra>
